<compile_context>
chip_gen: v5e
topology: v5e:2x2
jax: 0.10.0
libtpu: 0.0.40
codegen_flags: <defaults>
</compile_context>

<pallas_src>
import jax
import jax.numpy as jnp
from jax import lax
from jax.experimental import pallas as pl
from jax.experimental.pallas import tpu as pltpu


_LANE = 128
_SUBLANE = 8
_VMEM_WORKSET_BUDGET = 40 << 20    # resident tiles budget (fits v7x's 64 MiB physical VMEM)
_VMEM_LIMIT_BYTES = 48 << 20       # explicit scoped-VMEM limit (v5e default is only 16 MiB)
_FAST_WORD_TABLE_BYTES = 4 << 20   # vocab tables up to this (padded) size stay in VMEM
_MAX_SMEM_IDS = 64 * 1024          # guard on whole-array scalar-prefetched ids (SMEM capacity)


def _round_up(n, m):
    return ((n + m - 1) // m) * m


def _vmem_bytes(tile_s, D, itemsize, *, fast_word, word_vmem_bytes, has_tt, tt_vmem_bytes):
    """Padded VMEM working-set estimate for one configuration."""
    dp = _round_up(D, _LANE)
    tile = tile_s * dp * itemsize
    total = 2 * tile + 2 * tile            # output tile + position tile (double-buffered)
    if fast_word:
        total += 2 * word_vmem_bytes       # resident vocab table (count both pipeline buffers)
    else:
        total += tile                      # wbuf gather scratch (single buffer)
    if has_tt:
        total += 2 * tile_s * _LANE * 4    # (tile_s, 1) int32 tokentype-id tiles (lane padded)
        total += 2 * tt_vmem_bytes         # tokentype table
    return total


def _choose_tile_s(S, D, itemsize, **kw):
    """Largest power-of-two-ish divisor of S (multiple of 8) within the VMEM budget."""
    for t in (1024, 512, 256, 128, 64, 32, 16, 8):
        if S % t == 0 and _vmem_bytes(t, D, itemsize, **kw) <= _VMEM_WORKSET_BUDGET:
            return t
    raise ValueError("no (tile_s, D) embedding tile fits the VMEM budget; "
                     "embedding_dim is too large for this kernel")


def _make_fast_kernel(*, tile_s, ns, has_tt, num_tt):
    """Vocab table resident in VMEM: gather rows with dynamic vector loads (no DMA)."""

    def kernel(ids_ref, word_ref, pos_ref, *rest):
        if has_tt:
            tt_ids_ref, tt_tab_ref, out_ref = rest
        else:
            (out_ref,) = rest

        base = (pl.program_id(1) * ns + pl.program_id(0)) * tile_s

        def gather(r, carry):
            row = ids_ref[base + r]                       # scalar read from SMEM
            out_ref[pl.ds(r, 1), :] = word_ref[pl.ds(row, 1), :]
            return carry

        lax.fori_loop(0, tile_s, gather, 0, unroll=min(8, tile_s))

        x = out_ref[...] + pos_ref[...].astype(out_ref.dtype)
        if has_tt:
            tt = tt_ids_ref[...]                          # (tile_s, 1) int32
            for k in range(num_tt):                       # static tiny loop: T-way VPU select
                x = x + (tt == k).astype(x.dtype) * tt_tab_ref[pl.ds(k, 1), :].astype(x.dtype)
        # TODO(synk): dropout with p > 0 (training mode) would use pltpu.prng_*;
        # the module default (p = 0.0) is an identity, implemented as such.
        out_ref[...] = x.astype(out_ref.dtype)

    return kernel


def _make_slow_kernel(*, tile_s, ns, n_chunks, has_tt, num_tt):
    """Vocab table in HBM: per-row DMA gather, aggregated waits, chunked combine/store."""
    chunk = tile_s // n_chunks

    def kernel(ids_ref, word_hbm, pos_ref, *rest):
        if has_tt:
            tt_ids_ref, tt_tab_ref, out_ref, wbuf, sems = rest
        else:
            out_ref, wbuf, sems = rest

        base = (pl.program_id(1) * ns + pl.program_id(0)) * tile_s

        # Phase 1: issue EVERY row-gather DMA of this tile before waiting on any of
        # them, so their HBM latencies overlap.  Chunk c signals sems[c].
        for ci in range(n_chunks):
            cbase = ci * chunk

            def issue(r, carry, cbase=cbase, ci=ci):
                row = ids_ref[base + cbase + r]
                pltpu.make_async_copy(word_hbm.at[pl.ds(row, 1), :],
                                      wbuf.at[pl.ds(cbase + r, 1), :],
                                      sems.at[ci]).start()
                return carry

            lax.fori_loop(0, chunk, issue, 0, unroll=min(8, chunk))

        # Phase 2: ONE aggregated wait per chunk (DMA semaphores accumulate by transfer
        # size, so a (chunk, D) descriptor covers all of that chunk's row copies), then
        # combine + store that chunk while later chunks' DMAs are still in flight.
        for ci in range(n_chunks):
            cbase = ci * chunk
            pltpu.make_async_copy(word_hbm.at[pl.ds(0, chunk), :],
                                  wbuf.at[pl.ds(cbase, chunk), :],
                                  sems.at[ci]).wait()
            sl = pl.ds(cbase, chunk)
            x = wbuf[sl, :] + pos_ref[sl, :].astype(wbuf.dtype)
            if has_tt:
                tt = tt_ids_ref[sl, :]                    # (chunk, 1) int32
                for k in range(num_tt):
                    x = x + (tt == k).astype(x.dtype) * tt_tab_ref[pl.ds(k, 1), :].astype(x.dtype)
            # TODO(synk): dropout with p > 0 (training mode) would use pltpu.prng_*.
            out_ref[sl, :] = x.astype(out_ref.dtype)

    return kernel


def gpt_embedding_forward(input_ids,
                          word_weight,
                          pos_weight,
                          tokentype_weight=None,
                          position_ids=None,
                          tokentype_ids=None,
                          dropout_p: float = 0.0,
                          force_hbm_gather: bool = False):
    """Pallas implementation of GPTEmbedding.forward."""
    assert dropout_p == 0.0, "only p=0.0 (identity dropout) is implemented"
    B, S = input_ids.shape
    V, D = word_weight.shape
    P, Dp = pos_weight.shape
    assert Dp == D
    assert pos_weight.dtype == word_weight.dtype, "position table dtype must match word table"
    assert S % _SUBLANE == 0, "seq_length must be a multiple of 8 for (8,128)-aligned tiles"
    out_dtype = word_weight.dtype
    itemsize = jnp.dtype(out_dtype).itemsize

    has_tt = (tokentype_weight is not None) and (tokentype_ids is not None)
    num_tt = tokentype_weight.shape[0] if has_tt else 0
    if has_tt:
        assert tokentype_weight.dtype == word_weight.dtype

    word_vmem_bytes = _round_up(V, _SUBLANE) * _round_up(D, _LANE) * itemsize
    tt_vmem_bytes = (_round_up(num_tt, _SUBLANE) * _round_up(D, _LANE) * itemsize) if has_tt else 0
    fast_word = (word_vmem_bytes <= _FAST_WORD_TABLE_BYTES) and not force_hbm_gather

    tile_s = _choose_tile_s(S, D, itemsize, fast_word=fast_word,
                            word_vmem_bytes=word_vmem_bytes,
                            has_tt=has_tt, tt_vmem_bytes=tt_vmem_bytes)
    ns = S // tile_s

    # Token ids: clamp host-side (no in-kernel bounds check on the row gather) and
    # scalar-prefetch into SMEM.
    # TODO(synk): switch to per-tile SMEM BlockSpec blocks for very large B*S.
    assert B * S <= _MAX_SMEM_IDS, "B*S too large for whole-array SMEM id prefetch"
    flat_ids = jnp.clip(input_ids.reshape(-1).astype(jnp.int32), 0, V - 1)

    inputs = [word_weight]
    if fast_word:
        in_specs = [pl.BlockSpec((V, D), lambda s, b, ids: (0, 0))]   # resident in VMEM
    else:
        in_specs = [pl.BlockSpec(memory_space=pl.ANY)]                # table stays in HBM

    if position_ids is None:
        # Default arange(S) positions: contiguous slice of the table.  With batch as the
        # inner grid axis the block index (s, 0) repeats across b, so the pipeline DMAs
        # each position tile from HBM only once.
        assert S <= P, "seq_length exceeds max_position_embeddings"
        inputs.append(pos_weight)
        in_specs.append(pl.BlockSpec((tile_s, D), lambda s, b, ids: (s, 0)))
        pos_hbm_bytes = S * D * itemsize
    else:
        # Explicit positions: pre-gather once in the wrapper (single fused XLA gather)
        # and stream as a normal pipelined input -- no per-row position DMAs in-kernel.
        pids = jnp.broadcast_to(position_ids.astype(jnp.int32), (B, S)).reshape(-1)
        pids = jnp.clip(pids, 0, P - 1)
        pos_gathered = jnp.take(pos_weight, pids, axis=0)             # (B*S, D)
        inputs.append(pos_gathered)
        in_specs.append(pl.BlockSpec((tile_s, D), lambda s, b, ids: (b * ns + s, 0)))
        pos_hbm_bytes = B * S * D * itemsize

    if has_tt:
        tt_flat = jnp.broadcast_to(tokentype_ids.astype(jnp.int32), (B, S)).reshape(B * S, 1)
        tt_flat = jnp.clip(tt_flat, 0, num_tt - 1)
        inputs.append(tt_flat)
        in_specs.append(pl.BlockSpec((tile_s, 1), lambda s, b, ids: (b * ns + s, 0)))
        inputs.append(tokentype_weight)
        in_specs.append(pl.BlockSpec((num_tt, D), lambda s, b, ids: (0, 0)))

    out_spec = pl.BlockSpec((tile_s, D), lambda s, b, ids: (b * ns + s, 0))

    scratch = []
    if fast_word:
        kernel = _make_fast_kernel(tile_s=tile_s, ns=ns, has_tt=has_tt, num_tt=num_tt)
    else:
        n_chunks = 4 if tile_s >= 64 else (2 if tile_s >= 16 else 1)
        assert V >= tile_s // n_chunks, "vocab smaller than a gather chunk"
        scratch = [pltpu.VMEM((tile_s, D), out_dtype),
                   pltpu.SemaphoreType.DMA((n_chunks,))]
        kernel = _make_slow_kernel(tile_s=tile_s, ns=ns, n_chunks=n_chunks,
                                   has_tt=has_tt, num_tt=num_tt)

    word_hbm_bytes = V * D * itemsize if fast_word else B * S * D * itemsize
    bytes_accessed = (B * S * 4                            # token ids
                      + word_hbm_bytes                     # word-table traffic
                      + pos_hbm_bytes                      # position traffic
                      + ((B * S * 4 + num_tt * D * itemsize) if has_tt else 0)
                      + B * S * D * itemsize)              # output
    cost = pl.CostEstimate(flops=(2 if has_tt else 1) * B * S * D,
                           transcendentals=0,
                           bytes_accessed=int(bytes_accessed))

    out_flat = pl.pallas_call(
        kernel,
        out_shape=jax.ShapeDtypeStruct((B * S, D), out_dtype),
        grid_spec=pltpu.PrefetchScalarGridSpec(
            num_scalar_prefetch=1,
            grid=(ns, B),                 # batch innermost: position tile stays resident
            in_specs=in_specs,
            out_specs=out_spec,
            scratch_shapes=scratch),
        compiler_params=pltpu.CompilerParams(
            dimension_semantics=("parallel", "arbitrary"),
            vmem_limit_bytes=_VMEM_LIMIT_BYTES),
        cost_estimate=cost,
    )(flat_ids, *inputs)

    return out_flat.reshape(B, S, D)


if __name__ == "__main__":
    # Module hyperparameters (small, consistent with GPTEmbedding.__init__ defaults).
    embedding_dim = 32
    vocab_size = 128
    max_position_embeddings = 16
    batch, seq = 2, 8

    key = jax.random.PRNGKey(0)
    k_word, k_pos, k_ids, k_tt, k_ttid = jax.random.split(key, 5)

    word_weight = jax.random.normal(k_word, (vocab_size, embedding_dim), dtype=jnp.float32)
    pos_weight = jax.random.normal(k_pos, (max_position_embeddings, embedding_dim),
                                   dtype=jnp.float32)
    input_ids = jax.random.randint(k_ids, (batch, seq), 0, vocab_size, dtype=jnp.int32)

    # --- 1. Module defaults: arange positions, no tokentype (VMEM-resident fast path) ---
    out = gpt_embedding_forward(input_ids, word_weight, pos_weight)
    out = jax.block_until_ready(out)
    ref = jnp.take(word_weight, input_ids, axis=0) + pos_weight[:seq][None, :, :]
    assert out.shape == (batch, seq, embedding_dim)
    assert jnp.allclose(out, ref, atol=1e-5, rtol=1e-5)

    # --- 2. Full-featured path: forced HBM row-gather (aggregated chunked waits),
    #        explicit position_ids (pre-gathered), and tokentype embeddings ----------
    seq2, max_pos2, num_tt = 32, 32, 2
    pos_weight2 = jax.random.normal(k_pos, (max_pos2, embedding_dim), dtype=jnp.float32)
    tt_weight = jax.random.normal(k_tt, (num_tt, embedding_dim), dtype=jnp.float32)
    input_ids2 = jax.random.randint(k_ids, (batch, seq2), 0, vocab_size, dtype=jnp.int32)
    position_ids2 = (max_pos2 - 1 - jnp.arange(seq2, dtype=jnp.int32))[None, :]   # (1, S)
    tokentype_ids2 = jax.random.randint(k_ttid, (batch, seq2), 0, num_tt, dtype=jnp.int32)

    out2 = gpt_embedding_forward(input_ids2, word_weight, pos_weight2,
                                 tokentype_weight=tt_weight,
                                 position_ids=position_ids2,
                                 tokentype_ids=tokentype_ids2,
                                 force_hbm_gather=True)
    out2 = jax.block_until_ready(out2)
    ref2 = (jnp.take(word_weight, input_ids2, axis=0)
            + jnp.take(pos_weight2, jnp.broadcast_to(position_ids2, (batch, seq2)), axis=0)
            + jnp.take(tt_weight, tokentype_ids2, axis=0))
    assert out2.shape == (batch, seq2, embedding_dim)
    assert jnp.allclose(out2, ref2, atol=1e-5, rtol=1e-5)

    print("KERNEL_OK")
</pallas_src>

<mosaic_0001>
module attributes {stable_mosaic.version = 11 : i64} {
  func.func @kernel(%arg0: i32, %arg1: i32, %arg2: memref<16xi32, #tpu.memory_space<smem>>, %arg3: memref<128x32xf32, #tpu.memory_space<vmem>>, %arg4: memref<8x32xf32, #tpu.memory_space<vmem>>, %arg5: memref<8x32xf32, #tpu.memory_space<vmem>>) attributes {dimension_semantics = [#tpu.dimension_semantics<parallel>, #tpu.dimension_semantics<arbitrary>], iteration_bounds = array<i64: 1, 2>, scalar_prefetch = 1 : i64, scratch_operands = 0 : i64, tpu.core_type = #tpu.core_type<tc>, window_params = [{pipeline_mode = #tpu.pipeline_mode<synchronous>, transform_indices = @transform_0, window_bounds = array<i64: 128, 32>}, {transform_indices = @transform_1, window_bounds = array<i64: 8, 32>}, {transform_indices = @transform_2, window_bounds = array<i64: 8, 32>}]} {
    %c1_i32 = arith.constant 1 : i32
    %0 = arith.muli %arg1, %c1_i32 : i32
    %1 = arith.addi %0, %arg0 : i32
    %c8_i32 = arith.constant 8 : i32
    %2 = arith.muli %1, %c8_i32 : i32
    %c0_i32 = arith.constant 0 : i32
    %3 = arith.addi %2, %c0_i32 : i32
    %4 = arith.index_cast %3 : i32 to index
    %5 = memref.load %arg2[%4] : memref<16xi32, #tpu.memory_space<smem>>
    %6 = arith.index_cast %5 : i32 to index
    %c0 = arith.constant 0 : index
    %7 = vector.load %arg3[%6, %c0] : memref<128x32xf32, #tpu.memory_space<vmem>>, vector<1x32xf32>
    %8 = arith.index_cast %c0_i32 : i32 to index
    %c0_0 = arith.constant 0 : index
    %9 = vector.load %arg5[%8, %c0_0] : memref<8x32xf32, #tpu.memory_space<vmem>>, vector<1x32xf32>
    tpu.vector_store %arg5[%8, %c0_0], %7 {strides = array<i32>} : memref<8x32xf32, #tpu.memory_space<vmem>>, vector<1x32xf32>,
    %c1_i32_1 = arith.constant 1 : i32
    %10 = arith.addi %2, %c1_i32_1 : i32
    %11 = arith.index_cast %10 : i32 to index
    %12 = memref.load %arg2[%11] : memref<16xi32, #tpu.memory_space<smem>>
    %13 = arith.index_cast %12 : i32 to index
    %c0_2 = arith.constant 0 : index
    %14 = vector.load %arg3[%13, %c0_2] : memref<128x32xf32, #tpu.memory_space<vmem>>, vector<1x32xf32>
    %15 = arith.index_cast %c1_i32_1 : i32 to index
    %c0_3 = arith.constant 0 : index
    %16 = vector.load %arg5[%15, %c0_3] : memref<8x32xf32, #tpu.memory_space<vmem>>, vector<1x32xf32>
    tpu.vector_store %arg5[%15, %c0_3], %14 {strides = array<i32>} : memref<8x32xf32, #tpu.memory_space<vmem>>, vector<1x32xf32>,
    %c2_i32 = arith.constant 2 : i32
    %17 = arith.addi %2, %c2_i32 : i32
    %18 = arith.index_cast %17 : i32 to index
    %19 = memref.load %arg2[%18] : memref<16xi32, #tpu.memory_space<smem>>
    %20 = arith.index_cast %19 : i32 to index
    %c0_4 = arith.constant 0 : index
    %21 = vector.load %arg3[%20, %c0_4] : memref<128x32xf32, #tpu.memory_space<vmem>>, vector<1x32xf32>
    %22 = arith.index_cast %c2_i32 : i32 to index
    %c0_5 = arith.constant 0 : index
    %23 = vector.load %arg5[%22, %c0_5] : memref<8x32xf32, #tpu.memory_space<vmem>>, vector<1x32xf32>
    tpu.vector_store %arg5[%22, %c0_5], %21 {strides = array<i32>} : memref<8x32xf32, #tpu.memory_space<vmem>>, vector<1x32xf32>,
    %c3_i32 = arith.constant 3 : i32
    %24 = arith.addi %2, %c3_i32 : i32
    %25 = arith.index_cast %24 : i32 to index
    %26 = memref.load %arg2[%25] : memref<16xi32, #tpu.memory_space<smem>>
    %27 = arith.index_cast %26 : i32 to index
    %c0_6 = arith.constant 0 : index
    %28 = vector.load %arg3[%27, %c0_6] : memref<128x32xf32, #tpu.memory_space<vmem>>, vector<1x32xf32>
    %29 = arith.index_cast %c3_i32 : i32 to index
    %c0_7 = arith.constant 0 : index
    %30 = vector.load %arg5[%29, %c0_7] : memref<8x32xf32, #tpu.memory_space<vmem>>, vector<1x32xf32>
    tpu.vector_store %arg5[%29, %c0_7], %28 {strides = array<i32>} : memref<8x32xf32, #tpu.memory_space<vmem>>, vector<1x32xf32>,
    %c4_i32 = arith.constant 4 : i32
    %31 = arith.addi %2, %c4_i32 : i32
    %32 = arith.index_cast %31 : i32 to index
    %33 = memref.load %arg2[%32] : memref<16xi32, #tpu.memory_space<smem>>
    %34 = arith.index_cast %33 : i32 to index
    %c0_8 = arith.constant 0 : index
    %35 = vector.load %arg3[%34, %c0_8] : memref<128x32xf32, #tpu.memory_space<vmem>>, vector<1x32xf32>
    %36 = arith.index_cast %c4_i32 : i32 to index
    %c0_9 = arith.constant 0 : index
    %37 = vector.load %arg5[%36, %c0_9] : memref<8x32xf32, #tpu.memory_space<vmem>>, vector<1x32xf32>
    tpu.vector_store %arg5[%36, %c0_9], %35 {strides = array<i32>} : memref<8x32xf32, #tpu.memory_space<vmem>>, vector<1x32xf32>,
    %c5_i32 = arith.constant 5 : i32
    %38 = arith.addi %2, %c5_i32 : i32
    %39 = arith.index_cast %38 : i32 to index
    %40 = memref.load %arg2[%39] : memref<16xi32, #tpu.memory_space<smem>>
    %41 = arith.index_cast %40 : i32 to index
    %c0_10 = arith.constant 0 : index
    %42 = vector.load %arg3[%41, %c0_10] : memref<128x32xf32, #tpu.memory_space<vmem>>, vector<1x32xf32>
    %43 = arith.index_cast %c5_i32 : i32 to index
    %c0_11 = arith.constant 0 : index
    %44 = vector.load %arg5[%43, %c0_11] : memref<8x32xf32, #tpu.memory_space<vmem>>, vector<1x32xf32>
    tpu.vector_store %arg5[%43, %c0_11], %42 {strides = array<i32>} : memref<8x32xf32, #tpu.memory_space<vmem>>, vector<1x32xf32>,
    %c6_i32 = arith.constant 6 : i32
    %45 = arith.addi %2, %c6_i32 : i32
    %46 = arith.index_cast %45 : i32 to index
    %47 = memref.load %arg2[%46] : memref<16xi32, #tpu.memory_space<smem>>
    %48 = arith.index_cast %47 : i32 to index
    %c0_12 = arith.constant 0 : index
    %49 = vector.load %arg3[%48, %c0_12] : memref<128x32xf32, #tpu.memory_space<vmem>>, vector<1x32xf32>
    %50 = arith.index_cast %c6_i32 : i32 to index
    %c0_13 = arith.constant 0 : index
    %51 = vector.load %arg5[%50, %c0_13] : memref<8x32xf32, #tpu.memory_space<vmem>>, vector<1x32xf32>
    tpu.vector_store %arg5[%50, %c0_13], %49 {strides = array<i32>} : memref<8x32xf32, #tpu.memory_space<vmem>>, vector<1x32xf32>,
    %c7_i32 = arith.constant 7 : i32
    %52 = arith.addi %2, %c7_i32 : i32
    %53 = arith.index_cast %52 : i32 to index
    %54 = memref.load %arg2[%53] : memref<16xi32, #tpu.memory_space<smem>>
    %55 = arith.index_cast %54 : i32 to index
    %c0_14 = arith.constant 0 : index
    %56 = vector.load %arg3[%55, %c0_14] : memref<128x32xf32, #tpu.memory_space<vmem>>, vector<1x32xf32>
    %57 = arith.index_cast %c7_i32 : i32 to index
    %c0_15 = arith.constant 0 : index
    %58 = vector.load %arg5[%57, %c0_15] : memref<8x32xf32, #tpu.memory_space<vmem>>, vector<1x32xf32>
    tpu.vector_store %arg5[%57, %c0_15], %56 {strides = array<i32>} : memref<8x32xf32, #tpu.memory_space<vmem>>, vector<1x32xf32>,
    %c8_i32_16 = arith.constant 8 : i32
    %c0_17 = arith.constant 0 : index
    %c0_18 = arith.constant 0 : index
    %59 = vector.load %arg5[%c0_17, %c0_18] : memref<8x32xf32, #tpu.memory_space<vmem>>, vector<8x32xf32>
    %c0_19 = arith.constant 0 : index
    %c0_20 = arith.constant 0 : index
    %60 = vector.load %arg4[%c0_19, %c0_20] : memref<8x32xf32, #tpu.memory_space<vmem>>, vector<8x32xf32>
    %61 = arith.addf %59, %60 : vector<8x32xf32>
    %c0_21 = arith.constant 0 : index
    %c0_22 = arith.constant 0 : index
    %62 = vector.load %arg5[%c0_21, %c0_22] : memref<8x32xf32, #tpu.memory_space<vmem>>, vector<8x32xf32>
    tpu.vector_store %arg5[%c0_21, %c0_22], %61 {strides = array<i32>} : memref<8x32xf32, #tpu.memory_space<vmem>>, vector<8x32xf32>,
    return
  }
  func.func @transform_0(%arg0: i32, %arg1: i32, %arg2: memref<16xi32, #tpu.memory_space<smem>>) -> (i32, i32) {
    %c0_i32 = arith.constant 0 : i32
    %c0_i32_0 = arith.constant 0 : i32
    %c0_i32_1 = arith.constant 0 : i32
    return %c0_i32, %c0_i32_0 : i32, i32
  }
  func.func @transform_1(%arg0: i32, %arg1: i32, %arg2: memref<16xi32, #tpu.memory_space<smem>>) -> (i32, i32) {
    %c0_i32 = arith.constant 0 : i32
    %c0_i32_0 = arith.constant 0 : i32
    return %arg0, %c0_i32 : i32, i32
  }
  func.func @transform_2(%arg0: i32, %arg1: i32, %arg2: memref<16xi32, #tpu.memory_space<smem>>) -> (i32, i32) {
    %c1_i32 = arith.constant 1 : i32
    %0 = arith.muli %arg1, %c1_i32 : i32
    %1 = arith.addi %0, %arg0 : i32
    %c0_i32 = arith.constant 0 : i32
    %c0_i32_0 = arith.constant 0 : i32
    return %1, %c0_i32 : i32, i32
  }
}

</mosaic_0001>

<bundles_post_ra>
// kernel: tpu_custom_call.1
= control target key start
LH: loop header
LB: loop body
LE: loop exit
PB: predicated region body
PF: predicated region fallthrough
CT: control target
= control target key end

     0   :  { %s467_s15 = smov [#allocation3]   ;;  %s643_s0 = inlined_call_operand.vmem [shape: s32[16], index: 0, kind: input, shape index: {}]   ;;  %s644_s1 = inlined_call_operand.vmem [shape: f32[128,32], index: 1, kind: input, shape index: {}]   ;;  %s645_s2 = inlined_call_operand.vmem [shape: f32[16,32], index: 2, kind: input, shape index: {}]   ;;  %s646_s3 = inlined_call_operand.hbm [shape: f32[16,32], index: 3, kind: output, shape index: {}]  }
   0x1   :  { %s9_s14 = sshll.u32 %s643_s0, 4  ;;  %s10_s14 = int_to_ptr.vmem [resolvable:$true] %s9_s14 }
   0x2   :  { %12 = dma.vmem_to_smem %s10_s14, 16, %s467_s15, [#allocation2] }
   0x3   :  { %437 = dma.done.wait [#allocation2], 16 }
   0x4   :  { %438 = vsyncadd [#allocation2], 4294967280 }
   0x5   :  { %15 = sfence }
   0x6   :  { %16 = vsyncpa [#allocation5], 0 }
   0x7   :  { %18 = vsyncpa [#allocation5 + $0x1], 0  ;;  %s491_s16 = smov 0   ;;  %s493_s17 = smov 0  }
   0x8   :  { %s495_s18 = smov 0   ;;  %s497_s19 = smov 0  }
   0x9   :  { %s499_s20 = smov 0   ;;  %s501_s21 = smov 0  }
   0xa LB: > { %s306_s0 = sadd.s32 4294967295, %s465_s21   ;;  %s307_s22 = sadd.s32 4294967294, %s465_s21   ;;  %s465_s21 = sphi %s501_s21, %s24_s21   ;;  %s461_s20 = sphi %s499_s20, %s658_s20   ;;  %s457_s19 = sphi %s497_s19, %s657_s19   ;;  %s453_s18 = sphi %s495_s18, %s656_s18   ;;  %s449_s17 = sphi %s493_s17, %s655_s17   ;;  %s445_s16 = sphi %s491_s16, %s654_s16  }
   0xb   : > { %s33_s23 = sadd.s32 1, %s461_s20  ;;  %s92_s24 = sadd.s32 1, %s453_s18 }
   0xc   : > { %p34_p0 = scmp.ge.s32.totalorder %s33_s23, 2  ;;  %p102_p1 = scmp.ne.s32.totalorder %s453_s18, %s449_s17 }
   0xd   : > { %p103_p2 = scmp.eq.s32.totalorder %s306_s0, 1  ;;  %p108_p3 = scmp.ne.s32.totalorder %s449_s17, %s445_s16 }
   0xe   : > { %s660_s23 = smov (%p34_p0, %s33_s23), 0  ;;  %p109_p5 = scmp.eq.s32.totalorder %s307_s22, 1 }
   0xf   : > { %649 = sst [smem:[#allocation8_spill]] %s660_s23  ;;  %p529_p4 = por %p103_p2, %p102_p1 }
  0x10   : > { %s89_s26 = ssub.s32 %s461_s20, %s660_s23  ;;  %p310_p6 = scmp.ge.s32.totalorder %s465_s21, 1 }
  0x11   : > { %p90_p7 = scmp.eq.s32.totalorder %s89_s26, 0  ;;  %p536_p8 = por %p109_p5, %p108_p3 }
  0x12   : > { %p137_p9 = scmp.lt.s32.totalorder %s465_s21, 3 }
  0x13   : > { %s542_s28 = scalar_select %p90_p7, %s453_s18, %s92_s24  }
  0x14   : > { %p138_p10 = pnand %p310_p6, %p137_p9 }
  0x15   : > { %s647_s29 = sand.u32 (!%p138_p10), 1, %s449_s17   ;;  %s545_s30 = sshll.u32 (!%p138_p10), %s457_s19, 3 }
  0x16   : > { %141 = sbr.rel (%p138_p10) target bundleno = 53 (0x35), region = 28  ;;  %s311_s4 = sshll.u32 (!%p138_p10), %s647_s29, 3 }
  0x17   : > { %s165_s5 = sld [smem:[#allocation3 + %s545_s30]] (!%p138_p10)  ;;  %s170_s6 = sadd.s32 (!%p138_p10), 1, %s545_s30 }
  0x18   : > { %s171_s7 = sld [smem:[#allocation3 + %s170_s6]] (!%p138_p10)  ;;  %s175_s8 = sadd.s32 (!%p138_p10), 2, %s545_s30 }
  0x19   : > { %s176_s9 = sld [smem:[#allocation3 + %s175_s8]] (!%p138_p10)  ;;  %s180_s10 = sadd.s32 (!%p138_p10), 3, %s545_s30 }
  0x1a   : > { %s181_s11 = sld [smem:[#allocation3 + %s180_s10]] (!%p138_p10)  ;;  %s185_s12 = sadd.s32 (!%p138_p10), 4, %s545_s30 }
  0x1b   : > { %vm168_vm0 = vcmask 253952   ;;  %s186_s13 = sld [smem:[#allocation3 + %s185_s12]]  ;;  %s190_s14 = sadd.s32 5, %s545_s30  ;;  %v206_v8 = vld [vmem:[%s645_s2] sm:$0xff]  ;;  %vm208_vm1 = vcmask 261120  }
  0x1c   : > { %s191_s22 = sld [smem:[#allocation3 + %s190_s14]]  ;;  %s195_s24 = sadd.s32 6, %s545_s30 }
  0x1d   : > { %s166_s0 = scalar_lea.vmem %s644_s1, %s165_s5  ;;  %s200_s26 = sadd.s32 7, %s545_s30 }
  0x1e   : > { %v167_v0 = vld [vmem:[%s166_s0] sm:$0x1]  ;;  %s560_s29 = scalar_lea.vmem [#allocation4], %s311_s4  ;;  %s172_s10 = scalar_lea.vmem %s644_s1, %s171_s7 }
  0x1f   : > { %169 = vst.msk [vmem:[%s560_s29] sm:$0x1] %vm168_vm0, %v167_v0  ;;  %s196_s12 = sld [smem:[#allocation3 + %s195_s24]]  ;;  %v173_v1 = vld [vmem:[%s172_s10] sm:$0x1]  ;;  %s177_s15 = scalar_lea.vmem %s644_s1, %s176_s9 }
  0x20   : > { %s201_s4 = sld [smem:[#allocation3 + %s200_s26]]  ;;  %174 = vst.msk [vmem:[%s560_s29 + $0x1] sm:$0x1] %vm168_vm0, %v173_v1  ;;  %v178_v2 = vld [vmem:[%s177_s15] sm:$0x1]  ;;  %s182_s23 = scalar_lea.vmem %s644_s1, %s181_s11 }
  0x21   : > { %179 = vst.msk [vmem:[%s560_s29 + $0x2] sm:$0x1] %vm168_vm0, %v178_v2  ;;  %v183_v3 = vld [vmem:[%s182_s23] sm:$0x1]  ;;  %s187_s6 = scalar_lea.vmem %s644_s1, %s186_s13  ;;  %s222_s19 = scalar_lea.hbm %s646_s3, %s545_s30 }
  0x22   : > { %184 = vst.msk [vmem:[%s560_s29 + $0x3] sm:$0x1] %vm168_vm0, %v183_v3  ;;  %v188_v4 = vld [vmem:[%s187_s6] sm:$0x1]  ;;  %s192_s8 = scalar_lea.vmem %s644_s1, %s191_s22  ;;  %s226_s24 = sshll.u32 %s222_s19, 4  ;;  %s227_s24 = int_to_ptr.hbm [resolvable:$true] %s226_s24 }
  0x23   : > { %189 = vst.msk [vmem:[%s560_s29 + $0x4] sm:$0x1] %vm168_vm0, %v188_v4  ;;  %v193_v5 = vld [vmem:[%s192_s8] sm:$0x1]  ;;  %s399_s9 = sshra.s32 %s227_s24, 4  ;;  %s405_s11 = scalar_lea.hbm %s646_s3, 16  ;;  %s400_s9 = int_to_ptr.hbm [resolvable:$true] %s399_s9 }
  0x24   : > { %194 = vst.msk [vmem:[%s560_s29 + $0x5] sm:$0x1] %vm168_vm0, %v193_v5  ;;  %s401_s26 = scalar_lea.hbm %s400_s9, 8  ;;  %p406_p0 = scmp.lt.s32.totalorder %s400_s9, %s646_s3 }
  0x25   : > { %s197_s10 = scalar_lea.vmem %s644_s1, %s196_s12  ;;  %s224_s12 = sshll.u32 %s560_s29, 4  ;;  %s225_s12 = int_to_ptr.vmem [resolvable:$true] %s224_s12 }
  0x26   : > { %v198_v6 = vld [vmem:[%s197_s10] sm:$0x1]  ;;  %s202_s14 = scalar_lea.vmem %s644_s1, %s201_s4  ;;  %s652_s4 = sand.u32 1, %s449_s17  }
  0x27   : > { %199 = vst.msk [vmem:[%s560_s29 + $0x6] sm:$0x1] %vm168_vm0, %v198_v6  ;;  %v203_v7 = vld [vmem:[%s202_s14] sm:$0x1]  ;;  %s211_s6 = scalar_lea.sflag [#allocation5], %s652_s4  ;;  %p402_p11 = scmp.ne.s32.totalorder %s400_s9, %s401_s26 }
  0x28   : > { %204 = vst.msk [vmem:[%s560_s29 + $0x7] sm:$0x1] %vm168_vm0, %v203_v7  ;;  %p407_p1 = scmp.lt.s32.totalorder %s405_s11, %s401_s26 }
  0x29   : > { %p403_p12 = pnand %p402_p11, %p529_p4 }
  0x2a   : > { %p408_p2 = por %p407_p1, %p406_p0 }
  0x2b   : > { %p404_p13 = pneg %p403_p12 }
  0x2d   : > { %p409_p3 = pnand %p408_p2, %p404_p13 }
  0x2f   : > { %v205_v9 = vld [vmem:[%s560_s29] sm:$0xff] }
  0x30   : > { %v207_v10 = vadd.f32 %v206_v8, %v205_v9 }
  0x32   : > { %209 = vst.msk [vmem:[%s560_s29] sm:$0xff] %vm208_vm1, %v207_v10 }
  0x33   : > { %412 = shalt.err (!%p409_p3)
}
  0x34   : > { %317 = dma.vmem_to_hbm [thread:$0]  (%p529_p4), %s225_s12, 128, %s227_s24, %s211_s6  }
  0x35 PF: > { %p323_p5 = scmp.ge.s32.totalorder %s465_s21, 2  ;;  %s238_s29 = sand.u32 1, %s445_s16  }
  0x36   : > { %s239_s13 = scalar_lea.sflag [#allocation5], %s238_s29 }
  0x37   : > { %p320_p6 = pnand %p323_p5, %p536_p8 }
  0x39   : > { %p321_p7 = pneg %p320_p6 }
  0x3b   : > { %440 = dma.done.wait (%p321_p7), %s239_s13, 128  }
  0x3c   : > { %442 = vsyncadd (%p321_p7), %s239_s13, 4294967168  ;;  %s24_s21 = sadd.s32 1, %s465_s21   ;;  %s653_s25 = sld [smem:[#allocation8_spill]] }
  0x3d   : > { %p21_p9 = scmp.ge.s32.totalorder %s24_s21, 4   ;;  %s654_s16 = smov %s449_s17 }
  0x3e   : > { %s655_s17 = smov %s453_s18  ;;  %s656_s18 = smov %s542_s28 }
  0x3f   : > { %s657_s19 = smov %s461_s20  ;;  %23 = sbr.rel (!%p21_p9) target bundleno = 10 (0xa), region = 71 }
  0x42   : > { %s658_s20 = smov %s653_s25 }
  0x44   :  { %245 = vsyncpa [#allocation5], 1 }
  0x45   :  { %247 = vsyncpa [#allocation5 + $0x1], 1 }

</bundles_post_ra>
